<compile_context>
chip_gen: v7x
topology: tpu7x:2x2x1
jax: 0.10.0
libtpu: 0.0.40
codegen_flags: <defaults>
</compile_context>

<pallas_src>
import functools

import jax
import jax.numpy as jnp
from jax.experimental import pallas as pl
from jax.experimental.pallas import tpu as pltpu


def _round_up(x, m):
    return ((x + m - 1) // m) * m


def highway_kernel(x_ref, wall_ref, ball_ref, o_ref):
    num_layers = wall_ref.shape[0]
    sk = x_ref.shape[1]                     # padded feature dim (multiple of 8)

    h = x_ref[...].astype(jnp.float32)      # [Bp, Sk]

    # Static (fully unrolled) layer loop: layers are sequentially dependent and
    # L is a tiny compile-time constant, so straight-line code is cheapest.
    for layer in range(num_layers):
        # One fused matmul for gate | nonlinear | linear: [Bp, Np] with
        # Np = round_up(3*Sk, 128) (tight packing; trailing pad lanes unused).
        z = jnp.dot(h, wall_ref[layer], preferred_element_type=jnp.float32)
        z = z + ball_ref[layer]             # [1, Np] broadcast bias add

        g = jax.nn.sigmoid(z[:, 0:sk])            # gate
        n = jax.nn.relu(z[:, sk:2 * sk])          # f(G(x)), f = ReLU
        lin = z[:, 2 * sk:3 * sk]                 # Q(x)

        # g*n + (1-g)*lin rewritten to save one vmul + one vsub per element.
        h = lin + g * (n - lin)

    o_ref[...] = h.astype(o_ref.dtype)


def highway_prepare_params(wg, bg, wn, bn, wl, bl):
    """Fuse & pad parameters ONCE (parameter-prep time, not per forward call).

    wg, wn, wl : [L, S, S]  per-layer weights in "x @ W" layout
                            (i.e. transpose of torch nn.Linear.weight)
    bg, bn, bl : [L, S]     per-layer biases

    Returns:
      wall : [L, Sk, Np]  with Sk = round_up(S, 8), Np = round_up(3*Sk, 128)
      ball : [L, 1,  Np]
    """
    L, S, _ = wg.shape
    sk = _round_up(S, 8)            # K / feature dim: sublane multiple for f32
    np_ = _round_up(3 * sk, 128)    # concatenated output dim: lane multiple

    def pad_w(w):
        return jnp.pad(w.astype(jnp.float32),
                       ((0, 0), (0, sk - S), (0, sk - S)))

    def pad_b(b):
        return jnp.pad(b.astype(jnp.float32), ((0, 0), (0, sk - S)))

    wall = jnp.concatenate([pad_w(wg), pad_w(wn), pad_w(wl)], axis=-1)
    ball = jnp.concatenate([pad_b(bg), pad_b(bn), pad_b(bl)], axis=-1)
    # Pad the concatenated output dim up to a lane multiple; the extra columns
    # (and their zero biases) are never read back by the kernel.
    wall = jnp.pad(wall, ((0, 0), (0, 0), (0, np_ - 3 * sk)))   # [L, Sk, Np]
    ball = jnp.pad(ball, ((0, 0), (0, np_ - 3 * sk)))[:, None, :]  # [L, 1, Np]
    return wall, ball


@jax.jit
def highway_forward(x, wall, ball):
    """Highway forward.  x: [B, S]; wall/ball from highway_prepare_params."""
    B, S = x.shape
    L, sk, np_ = wall.shape

    b_pad = _round_up(B, 8)
    x_pad = jnp.pad(x, ((0, b_pad - B), (0, sk - S)))            # [Bp, Sk]

    # Explicit scoped-VMEM hint sized from the resident operands (weights,
    # biases, padded input, padded output), so larger S keeps compiling on
    # v6e (128 MiB physical) without silently hitting the 32 MiB default;
    # clamped so we never ask for more than fits v7x's 64 MiB physical VMEM.
    needed = (wall.size * wall.dtype.itemsize
              + ball.size * ball.dtype.itemsize
              + 2 * b_pad * sk * 4)
    vmem_limit = int(min(max(32 << 20, 2 * needed), 60 << 20))

    vmem = pltpu.MemorySpace.VMEM
    out_padded = pl.pallas_call(
        highway_kernel,
        out_shape=jax.ShapeDtypeStruct((b_pad, sk), x.dtype),
        in_specs=[pl.BlockSpec(memory_space=vmem),   # x (VMEM resident)
                  pl.BlockSpec(memory_space=vmem),   # fused weights
                  pl.BlockSpec(memory_space=vmem)],  # fused biases
        out_specs=pl.BlockSpec(memory_space=vmem),
        compiler_params=pltpu.CompilerParams(vmem_limit_bytes=vmem_limit),
    )(x_pad, wall, ball)

    return out_padded[:B, :S]


def highway_reference(x, wg, bg, wn, bn, wl, bl):
    """Plain-JAX reference matching the PyTorch forward (f = ReLU)."""
    h = x.astype(jnp.float32)
    for l in range(wg.shape[0]):
        g = jax.nn.sigmoid(h @ wg[l] + bg[l])
        n = jax.nn.relu(h @ wn[l] + bn[l])
        lin = h @ wl[l] + bl[l]
        h = g * n + (1.0 - g) * lin
    return h.astype(x.dtype)


if __name__ == "__main__":
    batch = 8
    size = 32
    num_layers = 3

    key = jax.random.PRNGKey(0)
    keys = jax.random.split(key, 7)
    scale = 1.0 / jnp.sqrt(size)

    x = jax.random.normal(keys[0], (batch, size), dtype=jnp.float32)
    wg = jax.random.uniform(keys[1], (num_layers, size, size),
                            minval=-scale, maxval=scale, dtype=jnp.float32)
    bg = jax.random.uniform(keys[2], (num_layers, size),
                            minval=-scale, maxval=scale, dtype=jnp.float32)
    wn = jax.random.uniform(keys[3], (num_layers, size, size),
                            minval=-scale, maxval=scale, dtype=jnp.float32)
    bn = jax.random.uniform(keys[4], (num_layers, size),
                            minval=-scale, maxval=scale, dtype=jnp.float32)
    wl = jax.random.uniform(keys[5], (num_layers, size, size),
                            minval=-scale, maxval=scale, dtype=jnp.float32)
    bl = jax.random.uniform(keys[6], (num_layers, size),
                            minval=-scale, maxval=scale, dtype=jnp.float32)

    # One-time parameter fusion/padding (kept out of the per-call path).
    wall, ball = jax.block_until_ready(
        highway_prepare_params(wg, bg, wn, bn, wl, bl))

    out = highway_forward(x, wall, ball)
    out = jax.block_until_ready(out)

    ref = highway_reference(x, wg, bg, wn, bn, wl, bl)
    assert out.shape == (batch, size)
    assert jnp.allclose(out, ref, atol=1e-5, rtol=1e-5), "mismatch vs reference"

    print("KERNEL_OK")
</pallas_src>

<mosaic_0001>
module attributes {stable_mosaic.version = 11 : i64} {
  func.func @highway_kernel(%arg0: memref<8x32xf32, #tpu.memory_space<vmem>>, %arg1: memref<3x32x128xf32, #tpu.memory_space<vmem>>, %arg2: memref<3x1x128xf32, #tpu.memory_space<vmem>>, %arg3: memref<8x32xf32, #tpu.memory_space<vmem>>) attributes {dimension_semantics = [], scalar_prefetch = 0 : i64, scratch_operands = 0 : i64, tpu.core_type = #tpu.core_type<tc>} {
    %c0 = arith.constant 0 : index
    %c0_0 = arith.constant 0 : index
    %0 = vector.load %arg0[%c0, %c0_0] : memref<8x32xf32, #tpu.memory_space<vmem>>, vector<8x32xf32>
    %c0_1 = arith.constant 0 : index
    %c0_2 = arith.constant 0 : index
    %c0_3 = arith.constant 0 : index
    %1 = vector.load %arg1[%c0_1, %c0_2, %c0_3] : memref<3x32x128xf32, #tpu.memory_space<vmem>>, vector<1x32x128xf32>
    %2 = vector.shape_cast %1 : vector<1x32x128xf32> to vector<32x128xf32>
    %cst = arith.constant dense<0.000000e+00> : vector<8x128xf32>
    %3 = tpu.matmul %0, %2, %cst {dimension_numbers = #tpu.dot_dimension_numbers<[1], [0], [0], [1], [0, 0, 1, 1], [], []>} : vector<8x32xf32>, vector<32x128xf32>, vector<8x128xf32> -> vector<8x128xf32>
    %c0_4 = arith.constant 0 : index
    %c0_5 = arith.constant 0 : index
    %c0_6 = arith.constant 0 : index
    %4 = vector.load %arg2[%c0_4, %c0_5, %c0_6] : memref<3x1x128xf32, #tpu.memory_space<vmem>>, vector<1x1x128xf32>
    %5 = vector.shape_cast %4 : vector<1x1x128xf32> to vector<1x128xf32>
    %6 = vector.broadcast %5 : vector<1x128xf32> to vector<8x128xf32>
    %7 = arith.addf %3, %6 : vector<8x128xf32>
    %8 = vector.extract_strided_slice %7 {offsets = [0, 0], sizes = [8, 32], strides = [1, 1]} : vector<8x128xf32> to vector<8x32xf32>
    %9 = arith.negf %8 : vector<8x32xf32>
    %10 = math.exp %9 : vector<8x32xf32>
    %cst_7 = arith.constant 1.000000e+00 : f32
    %11 = vector.broadcast %cst_7 : f32 to vector<8x32xf32>
    %12 = arith.addf %11, %10 : vector<8x32xf32>
    %13 = arith.divf %11, %12 : vector<8x32xf32>
    %14 = vector.extract_strided_slice %7 {offsets = [0, 32], sizes = [8, 32], strides = [1, 1]} : vector<8x128xf32> to vector<8x32xf32>
    %cst_8 = arith.constant 0.000000e+00 : f32
    %15 = vector.broadcast %cst_8 : f32 to vector<8x32xf32>
    %16 = arith.maximumf %14, %15 : vector<8x32xf32>
    %17 = vector.extract_strided_slice %7 {offsets = [0, 64], sizes = [8, 32], strides = [1, 1]} : vector<8x128xf32> to vector<8x32xf32>
    %18 = arith.subf %16, %17 : vector<8x32xf32>
    %19 = arith.mulf %13, %18 : vector<8x32xf32>
    %20 = arith.addf %17, %19 : vector<8x32xf32>
    %c1 = arith.constant 1 : index
    %c0_9 = arith.constant 0 : index
    %c0_10 = arith.constant 0 : index
    %21 = vector.load %arg1[%c1, %c0_9, %c0_10] : memref<3x32x128xf32, #tpu.memory_space<vmem>>, vector<1x32x128xf32>
    %22 = vector.shape_cast %21 : vector<1x32x128xf32> to vector<32x128xf32>
    %cst_11 = arith.constant dense<0.000000e+00> : vector<8x128xf32>
    %23 = tpu.matmul %20, %22, %cst_11 {dimension_numbers = #tpu.dot_dimension_numbers<[1], [0], [0], [1], [0, 0, 1, 1], [], []>} : vector<8x32xf32>, vector<32x128xf32>, vector<8x128xf32> -> vector<8x128xf32>
    %c1_12 = arith.constant 1 : index
    %c0_13 = arith.constant 0 : index
    %c0_14 = arith.constant 0 : index
    %24 = vector.load %arg2[%c1_12, %c0_13, %c0_14] : memref<3x1x128xf32, #tpu.memory_space<vmem>>, vector<1x1x128xf32>
    %25 = vector.shape_cast %24 : vector<1x1x128xf32> to vector<1x128xf32>
    %26 = vector.broadcast %25 : vector<1x128xf32> to vector<8x128xf32>
    %27 = arith.addf %23, %26 : vector<8x128xf32>
    %28 = vector.extract_strided_slice %27 {offsets = [0, 0], sizes = [8, 32], strides = [1, 1]} : vector<8x128xf32> to vector<8x32xf32>
    %29 = arith.negf %28 : vector<8x32xf32>
    %30 = math.exp %29 : vector<8x32xf32>
    %cst_15 = arith.constant 1.000000e+00 : f32
    %31 = vector.broadcast %cst_15 : f32 to vector<8x32xf32>
    %32 = arith.addf %31, %30 : vector<8x32xf32>
    %33 = arith.divf %31, %32 : vector<8x32xf32>
    %34 = vector.extract_strided_slice %27 {offsets = [0, 32], sizes = [8, 32], strides = [1, 1]} : vector<8x128xf32> to vector<8x32xf32>
    %cst_16 = arith.constant 0.000000e+00 : f32
    %35 = vector.broadcast %cst_16 : f32 to vector<8x32xf32>
    %36 = arith.maximumf %34, %35 : vector<8x32xf32>
    %37 = vector.extract_strided_slice %27 {offsets = [0, 64], sizes = [8, 32], strides = [1, 1]} : vector<8x128xf32> to vector<8x32xf32>
    %38 = arith.subf %36, %37 : vector<8x32xf32>
    %39 = arith.mulf %33, %38 : vector<8x32xf32>
    %40 = arith.addf %37, %39 : vector<8x32xf32>
    %c2 = arith.constant 2 : index
    %c0_17 = arith.constant 0 : index
    %c0_18 = arith.constant 0 : index
    %41 = vector.load %arg1[%c2, %c0_17, %c0_18] : memref<3x32x128xf32, #tpu.memory_space<vmem>>, vector<1x32x128xf32>
    %42 = vector.shape_cast %41 : vector<1x32x128xf32> to vector<32x128xf32>
    %cst_19 = arith.constant dense<0.000000e+00> : vector<8x128xf32>
    %43 = tpu.matmul %40, %42, %cst_19 {dimension_numbers = #tpu.dot_dimension_numbers<[1], [0], [0], [1], [0, 0, 1, 1], [], []>} : vector<8x32xf32>, vector<32x128xf32>, vector<8x128xf32> -> vector<8x128xf32>
    %c2_20 = arith.constant 2 : index
    %c0_21 = arith.constant 0 : index
    %c0_22 = arith.constant 0 : index
    %44 = vector.load %arg2[%c2_20, %c0_21, %c0_22] : memref<3x1x128xf32, #tpu.memory_space<vmem>>, vector<1x1x128xf32>
    %45 = vector.shape_cast %44 : vector<1x1x128xf32> to vector<1x128xf32>
    %46 = vector.broadcast %45 : vector<1x128xf32> to vector<8x128xf32>
    %47 = arith.addf %43, %46 : vector<8x128xf32>
    %48 = vector.extract_strided_slice %47 {offsets = [0, 0], sizes = [8, 32], strides = [1, 1]} : vector<8x128xf32> to vector<8x32xf32>
    %49 = arith.negf %48 : vector<8x32xf32>
    %50 = math.exp %49 : vector<8x32xf32>
    %cst_23 = arith.constant 1.000000e+00 : f32
    %51 = vector.broadcast %cst_23 : f32 to vector<8x32xf32>
    %52 = arith.addf %51, %50 : vector<8x32xf32>
    %53 = arith.divf %51, %52 : vector<8x32xf32>
    %54 = vector.extract_strided_slice %47 {offsets = [0, 32], sizes = [8, 32], strides = [1, 1]} : vector<8x128xf32> to vector<8x32xf32>
    %cst_24 = arith.constant 0.000000e+00 : f32
    %55 = vector.broadcast %cst_24 : f32 to vector<8x32xf32>
    %56 = arith.maximumf %54, %55 : vector<8x32xf32>
    %57 = vector.extract_strided_slice %47 {offsets = [0, 64], sizes = [8, 32], strides = [1, 1]} : vector<8x128xf32> to vector<8x32xf32>
    %58 = arith.subf %56, %57 : vector<8x32xf32>
    %59 = arith.mulf %53, %58 : vector<8x32xf32>
    %60 = arith.addf %57, %59 : vector<8x32xf32>
    %c0_25 = arith.constant 0 : index
    %c0_26 = arith.constant 0 : index
    %61 = vector.load %arg3[%c0_25, %c0_26] : memref<8x32xf32, #tpu.memory_space<vmem>>, vector<8x32xf32>
    tpu.vector_store %arg3[%c0_25, %c0_26], %60 {strides = array<i32>} : memref<8x32xf32, #tpu.memory_space<vmem>>, vector<8x32xf32>,
    return
  }
}

</mosaic_0001>

<bundles_post_ra>
// kernel: highway_forward.1
= control target key start
LH: loop header
LB: loop body
LE: loop exit
PB: predicated region body
PF: predicated region fallthrough
CT: control target
= control target key end

     0   :  { %8 = vsyncpa [#allocation3], 0  ;;  %s668_s0 = inlined_call_operand.hbm [shape: f32[8,32], index: 0, kind: input, shape index: {}]   ;;  %s669_s1 = inlined_call_operand.hbm [shape: f32[3,32,128], index: 1, kind: input, shape index: {}]   ;;  %s670_s2 = inlined_call_operand.vmem [shape: f32[3,1,128], index: 2, kind: input, shape index: {}]   ;;  %s671_s3 = inlined_call_operand.hbm [shape: f32[8,32], index: 3, kind: output, shape index: {}]  }
   0x1   :  { %9 = vsyncpa [#allocation6], 0 }
   0x2   :  { %10 = vsyncpa [#allocation4], 0  ;;  %s561_s12 = smov [#allocation2]   ;;  %s562_s14 = smov [#allocation5]  }
   0x3   :  { %s17_s13 = sshll.u32 %s561_s12, 4  ;;  %s26_s15 = sshll.u32 %s562_s14, 4  ;;  %s18_s13 = int_to_ptr.vmem [resolvable:$true] %s17_s13  ;;  %s591_s15 = int_to_ptr.vmem [resolvable:$true] %s26_s15 }
   0x4   :  { %s489_s18 = scalar_lea.hbm %s668_s0, 128 }
   0x5   :  { %p490_p0 = scmp.ne.s32.totalorder %s668_s0, %s489_s18  ;;  %p493_p1 = scmp.lt.u32.totalorder %s489_s18, %s668_s0 }
   0x7   :  { %p495_p2 = pnand %p493_p1, %p490_p0 }
   0x9   :  { %498 = shalt.err (!%p495_p2)
}
   0xa   :  { %s499_s23 = scalar_lea.vmem %s18_s13, 128  ;;  %p504_p4 = scmp.lt.s32.totalorder %s18_s13, %s18_s13 }
   0xb   :  { %p500_p3 = scmp.ne.s32.totalorder %s18_s13, %s499_s23  ;;  %p505_p5 = scmp.lt.s32.totalorder %s499_s23, %s499_s23 }
   0xd   :  { %p506_p6 = por %p505_p5, %p504_p4 }
   0xf   :  { %p507_p7 = pnand %p506_p6, %p500_p3 }
  0x11   :  { %510 = shalt.err (!%p507_p7)
}
  0x12   :  { %20 = dma.hbm_to_vmem [thread:$0]  %s668_s0, 128, %s18_s13, [#allocation3]  }
  0x13   :  { %s511_s28 = scalar_lea.hbm %s669_s1, 1536 }
  0x14   :  { %p512_p8 = scmp.ne.s32.totalorder %s669_s1, %s511_s28  ;;  %p515_p9 = scmp.lt.u32.totalorder %s511_s28, %s669_s1 }
  0x16   :  { %p517_p10 = pnand %p515_p9, %p512_p8 }
  0x18   :  { %520 = shalt.err (!%p517_p10)
}
  0x19   :  { %s521_s6 = scalar_lea.vmem %s591_s15, 1536  ;;  %p526_p12 = scmp.lt.s32.totalorder %s591_s15, %s591_s15 }
  0x1a   :  { %p522_p11 = scmp.ne.s32.totalorder %s591_s15, %s521_s6  ;;  %p527_p13 = scmp.lt.s32.totalorder %s521_s6, %s521_s6 }
  0x1c   :  { %p528_p0 = por %p527_p13, %p526_p12 }
  0x1e   :  { %p529_p1 = pnand %p528_p0, %p522_p11 }
  0x20   :  { %532 = shalt.err (!%p529_p1)
}
  0x21   :  { %s563_s0 = smov 128   ;;  %s564_s7 = smov 8  }
  0x22   :  { %32 = dma.hbm_to_vmem [thread:$0]  %s669_s1, 1536, %s591_s15, [#allocation6], %s563_s0, %s563_s0, %s564_s7  }
  0x23   :  { %555 = dma.done.wait [#allocation3], 128  }
  0x24   :  { %556 = vsyncadd [#allocation3], 4294967168 }
  0x25   :  { %557 = dma.done.wait [#allocation6], 1536  }
  0x26   :  { %558 = vsyncadd [#allocation6], 4294965760  ;;  %v565_v0 = vmov 0.0|0.0   ;;  %vm566_vm0 = vmmov 0   ;;  %v567_v1 = vmov 0.0   ;;  %v42_v2 = vld [vmem:[#allocation5] sm:$0xff] }
  0x27   :  { %449 = vmatprep.subr.bf16.mxu0 %v565_v0  ;;  %424 = vmatprep.mubr.msk.f32.mxu0 %vm566_vm0, %v567_v1  ;;  %v43_v3 = vld [vmem:[#allocation5 + $0x8] sm:$0xff]  ;;  %v44_v4 = vld [vmem:[#allocation5 + $0x10] sm:$0xff]  ;;  %v45_v6 = vld [vmem:[#allocation5 + $0x18] sm:$0xff]  ;;  %vm53_vm1 = vcmask 261120   ;;  %s568_s11 = smov 96   ;;  %s569_s12 = smov 64  }
  0x28   :  { %455 = vmatprep.subr.bf16.mxu1 %v565_v0  ;;  %435 = vmatprep.mubr.msk.f32.mxu1 %vm566_vm0, %v567_v1  ;;  %v450_v5 = vpack.c.bf16 %v43_v3, %v42_v2  ;;  %v453_v7 = vpack.c.bf16 %v45_v6, %v44_v4  ;;  %v41_v8 = vld [vmem:[#allocation2] sm:$0xff]  ;;  %v150_v19 = vld [vmem:[#allocation5 + $0x20] sm:$0xff]  ;;  %v151_v20 = vld [vmem:[#allocation5 + $0x28] sm:$0xff] }
  0x29   :  { %v390_v9 = vld [vmem:[%s670_s2] ss:$0 sm:$0xff]  ;;  %v152_v21 = vld [vmem:[#allocation5 + $0x30] sm:$0xff]  ;;  %v456_v22 = vpack.c.bf16 %v151_v20, %v150_v19  ;;  %v394_v31 = vld [vmem:[%s670_s2 + $0x1] ss:$0 sm:$0xff] }
  0x2a   :  { %451 = vmatpush3.bf16.msra.mxu0 %v450_v5  ;;  %v153_v23 = vld [vmem:[#allocation5 + $0x38] sm:$0xff]  ;;  %v260_v41 = vld [vmem:[#allocation5 + $0x40] sm:$0xff]  ;;  %v261_v42 = vld [vmem:[#allocation5 + $0x48] sm:$0xff] }
  0x2b   :  { %452 = vmatprep.subr.bf16.mxu0 %v565_v0  ;;  %457 = vmatpush3.bf16.msra.mxu1 %v456_v22  ;;  %v459_v24 = vpack.c.bf16 %v153_v23, %v152_v21  ;;  %v262_v43 = vld [vmem:[#allocation5 + $0x50] sm:$0xff]  ;;  %v462_v44 = vpack.c.bf16 %v261_v42, %v260_v41  ;;  %v263_v45 = vld [vmem:[#allocation5 + $0x58] sm:$0xff] }
  0x2c   :  { %458 = vmatprep.subr.bf16.mxu1 %v565_v0  ;;  %v465_v46 = vpack.c.bf16 %v263_v45, %v262_v43  ;;  %v398_v53 = vld [vmem:[%s670_s2 + $0x2] ss:$0 sm:$0xff]  ;;  %s570_s2 = smov [#allocation7]  }
  0x2d   :  { %s380_s17 = sshll.u32 %s570_s2, 4  ;;  %s381_s17 = int_to_ptr.vmem [resolvable:$true] %s380_s17 }
  0x2e   :  { %454 = vmatpush3.bf16.msra.mxu0 %v453_v7  ;;  %s533_s18 = scalar_lea.vmem %s381_s17, 128  ;;  %p538_p3 = scmp.lt.s32.totalorder %s381_s17, %s381_s17 }
  0x2f   :  { %461 = vmatprep.subr.bf16.mxu0 %v565_v0  ;;  %460 = vmatpush3.bf16.msra.mxu1 %v459_v24  ;;  %p534_p2 = scmp.ne.s32.totalorder %s381_s17, %s533_s18  ;;  %p539_p4 = scmp.lt.s32.totalorder %s533_s18, %s533_s18 }
  0x31   :  { %425 = vmatmul.mubr.msk.f32.vlgmr.msra.gmra.mrb[0].mxu0 %vm53_vm1, %v41_v8  ;;  %p540_p5 = por %p539_p4, %p538_p3 }
  0x32   :  { %446 = vmatprep.mubr.msk.f32.mxu0 %vm566_vm0, %v567_v1  ;;  %463 = vmatpush3.bf16.msra.mxu0 %v462_v44 }
  0x33   :  { %464 = vmatprep.subr.bf16.mxu0 %v565_v0  ;;  %p541_p6 = pnand %p540_p5, %p534_p2 }
  0x36   :  { %466 = vmatpush3.bf16.msra.mxu0 %v465_v46 }
 0x104   :  { %v123_v10 = vpop.f32.mrb[0].mxu0 }
 0x105   :  { %v124_v11 = vadd.f32 %v390_v9, %v123_v10  ;;  %v426_v12 = vpop.f32.mrb[1].mxu0 }
 0x107   :  { %135 = vrot.lane.b32.xlu0 %v124_v11, %s568_s11  ;;  %v133_v13 = vmax.f32 %v124_v11, 0.0  ;;  %v392_v16 = vmul.f32 -1.442695, %v124_v11 }
 0x109   :  { %477 = vpow2.f32 %v392_v16 }
 0x113   :  { %v478_v17 = vpop.eup %477 }
 0x114   :  { %v130_v18 = vadd.f32 1.0, %v478_v17 }
 0x116   :  { %479 = vrcp.f32 %v130_v18 }
 0x120   :  { %v480_v25 = vpop.eup %479 }
 0x179   :  { %v136_v14 = vpop.permute.xlu0 %135 }
 0x17a   :  { %v138_v15 = vsub.f32 %v133_v13, %v136_v14 }
 0x17c   :  { %140 = vrot.lane.b32.xlu0 %v138_v15, %s568_s11 }
 0x1ee   :  { %v141_v26 = vpop.permute.xlu0 %140 }
 0x1ef   :  { %v143_v27 = vmul.f32 %v480_v25, %v141_v26 }
 0x1f1   :  { %145 = vrot.lane.b32.xlu1 %v143_v27, %s569_s12 }
 0x263   :  { %v146_v28 = vpop.permute.xlu1 %145 }
 0x264   :  { %v148_v29 = vadd.f32 %v146_v28, %v124_v11 }
 0x266   :  { %163 = vrot.lane.b32.xlu1 %v148_v29, %s569_s12 }
 0x2d8   :  { %v164_v30 = vpop.permute.xlu1 %163 }
 0x2d9   :  { %436 = vmatmul.mubr.msk.f32.vlgmr.msra.gmra.mrb[0].mxu1 %vm53_vm1, %v164_v30 }
 0x3ac   :  { %v233_v32 = vpop.f32.mrb[0].mxu1 }
 0x3ad   :  { %v234_v33 = vadd.f32 %v394_v31, %v233_v32  ;;  %v437_v34 = vpop.f32.mrb[1].mxu1 }
 0x3af   :  { %245 = vrot.lane.b32.xlu0 %v234_v33, %s568_s11  ;;  %v243_v35 = vmax.f32 %v234_v33, 0.0  ;;  %v396_v38 = vmul.f32 -1.442695, %v234_v33 }
 0x3b1   :  { %481 = vpow2.f32 %v396_v38 }
 0x3bb   :  { %v482_v39 = vpop.eup %481 }
 0x3bc   :  { %v240_v40 = vadd.f32 1.0, %v482_v39 }
 0x3be   :  { %483 = vrcp.f32 %v240_v40 }
 0x3c8   :  { %v484_v47 = vpop.eup %483 }
 0x421   :  { %v246_v36 = vpop.permute.xlu0 %245 }
 0x422   :  { %v248_v37 = vsub.f32 %v243_v35, %v246_v36 }
 0x424   :  { %250 = vrot.lane.b32.xlu1 %v248_v37, %s568_s11 }
 0x496   :  { %v251_v48 = vpop.permute.xlu1 %250 }
 0x497   :  { %v253_v49 = vmul.f32 %v484_v47, %v251_v48 }
 0x499   :  { %255 = vrot.lane.b32.xlu0 %v253_v49, %s569_s12 }
 0x50b   :  { %v256_v50 = vpop.permute.xlu0 %255 }
 0x50c   :  { %v258_v51 = vadd.f32 %v256_v50, %v234_v33 }
 0x50e   :  { %273 = vrot.lane.b32.xlu1 %v258_v51, %s569_s12 }
 0x580   :  { %v274_v52 = vpop.permute.xlu1 %273 }
 0x581   :  { %447 = vmatmul.mubr.msk.f32.vlgmr.msra.gmra.mrb[2].mxu0 %vm53_vm1, %v274_v52 }
 0x654   :  { %v343_v54 = vpop.f32.mrb[2].mxu0 }
 0x655   :  { %v344_v55 = vadd.f32 %v398_v53, %v343_v54  ;;  %v448_v56 = vpop.f32.mrb[3].mxu0 }
 0x657   :  { %355 = vrot.lane.b32.xlu0 %v344_v55, %s568_s11  ;;  %v353_v57 = vmax.f32 %v344_v55, 0.0  ;;  %v400_v60 = vmul.f32 -1.442695, %v344_v55 }
 0x659   :  { %485 = vpow2.f32 %v400_v60 }
 0x663   :  { %v486_v61 = vpop.eup %485 }
 0x664   :  { %v350_v62 = vadd.f32 1.0, %v486_v61 }
 0x666   :  { %487 = vrcp.f32 %v350_v62 }
 0x670   :  { %v488_v63 = vpop.eup %487 }
 0x6c9   :  { %v356_v58 = vpop.permute.xlu0 %355 }
 0x6ca   :  { %v358_v59 = vsub.f32 %v353_v57, %v356_v58 }
 0x6cc   :  { %360 = vrot.lane.b32.xlu1 %v358_v59, %s568_s11 }
 0x73e   :  { %v361_v0 = vpop.permute.xlu1 %360 }
 0x73f   :  { %v363_v1 = vmul.f32 %v488_v63, %v361_v0 }
 0x741   :  { %365 = vrot.lane.b32.xlu0 %v363_v1, %s569_s12 }
 0x7b3   :  { %v366_v2 = vpop.permute.xlu0 %365 }
 0x7b4   :  { %v368_v3 = vadd.f32 %v366_v2, %v344_v55 }
 0x7b6   :  { %370 = vrot.lane.b32.xlu1 %v368_v3, %s569_s12 }
 0x828   :  { %v371_v4 = vpop.permute.xlu1 %370 }
 0x829   :  { %373 = vst.msk [vmem:[#allocation7] sm:$0xff] %vm53_vm1, %v371_v4 }
 0x82a   :  { %544 = shalt.err (!%p541_p6)
}
 0x82b   :  { %s545_s21 = scalar_lea.hbm %s671_s3, 128 }
 0x82c   :  { %p546_p7 = scmp.ne.s32.totalorder %s671_s3, %s545_s21  ;;  %p549_p8 = scmp.lt.u32.totalorder %s545_s21, %s671_s3 }
 0x82e   :  { %p551_p9 = pnand %p549_p8, %p546_p7 }
 0x830   :  { %554 = shalt.err (!%p551_p9)
}
 0x831   :  { %383 = dma.vmem_to_hbm [thread:$0]  %s381_s17, 128, %s671_s3, [#allocation4]  }
 0x832   :  { %559 = dma.done.wait [#allocation4], 128  }
 0x833   :  { %560 = vsyncadd [#allocation4], 4294967168 }
 0x834   :  { %387 = vsyncpa [#allocation3], 1 }
 0x835   :  { %388 = vsyncpa [#allocation6], 1 }
 0x836   :  { %389 = vsyncpa [#allocation4], 1 }

</bundles_post_ra>
